<compile_context>
chip_gen: v7x
topology: tpu7x:2x2x1
jax: 0.10.0
libtpu: 0.0.40
codegen_flags: <defaults>
</compile_context>

<pallas_src>
import functools

import jax
import jax.numpy as jnp
from jax.experimental import pallas as pl
from jax.experimental.pallas import tpu as pltpu


# ----------------------------- Pallas kernel --------------------------------
def detr_kernel(num_heads, matmul_dtype,
                x_ref, pos_ref,
                wq_ref, wk_ref, wv_ref, bq_ref, bk_ref, bv_ref,
                wo_ref, bo_ref,
                w1_ref, b1_ref, w2_ref, b2_ref,
                wh_ref, bh_ref,
                out_ref):
    S, E = x_ref.shape
    H = num_heads
    D = E // H
    scale = 1.0 / (D ** 0.5)

    # x + positional encoding (f32), then a single cast for the MXU matmuls.
    h = (x_ref[...] + pos_ref[...]).astype(matmul_dtype)            # (S, E)
    # Hoisted broadcast, reused by the three per-head projections.
    h_b = jnp.broadcast_to(h, (H, S, E))                            # (H, S, E)

    # Per-head Q/K/V projections: one batched matmul each, f32 accumulation.
    q = jnp.einsum('hse,hed->hsd', h_b, wq_ref[...],
                   preferred_element_type=jnp.float32) + bq_ref[...]
    k = jnp.einsum('hse,hed->hsd', h_b, wk_ref[...],
                   preferred_element_type=jnp.float32) + bk_ref[...]
    v = jnp.einsum('hse,hed->hsd', h_b, wv_ref[...],
                   preferred_element_type=jnp.float32) + bv_ref[...]

    # Scaled dot-product attention, batched over heads (no per-head loop).
    qs = (q * scale).astype(matmul_dtype)
    kk = k.astype(matmul_dtype)
    vv = v.astype(matmul_dtype)
    s = jnp.einsum('hqd,hkd->hqk', qs, kk,
                   preferred_element_type=jnp.float32)              # (H, S, S)
    s = s - jnp.max(s, axis=-1, keepdims=True)
    p = jnp.exp(s)
    # EUP approximate reciprocal instead of a VALU divide.
    p = p * pl.reciprocal(jnp.sum(p, axis=-1, keepdims=True), approx=True)
    o = jnp.einsum('hqk,hkd->hqd', p.astype(matmul_dtype), vv,
                   preferred_element_type=jnp.float32)              # (H, S, D)

    # Output projection with per-head weight blocks (H, D, E): one batched
    # matmul plus a reduction over heads -- no transpose back to (S, E) needed.
    attn = jnp.einsum('hsd,hde->hse', o.astype(matmul_dtype), wo_ref[...],
                      preferred_element_type=jnp.float32).sum(axis=0)
    attn = attn + bo_ref[...]                                       # (S, E)

    # FFN: Linear -> ReLU -> Linear.
    ff = jnp.dot(attn.astype(matmul_dtype), w1_ref[...],
                 preferred_element_type=jnp.float32) + b1_ref[...]
    ff = jnp.maximum(ff, 0.0)
    ff = jnp.dot(ff.astype(matmul_dtype), w2_ref[...],
                 preferred_element_type=jnp.float32) + b2_ref[...]

    # Fused (class | bbox) head: one matmul, one lane-dense (S, P) store.
    out_ref[...] = (jnp.dot(ff.astype(matmul_dtype), wh_ref[...],
                            preferred_element_type=jnp.float32)
                    + bh_ref[...]).astype(out_ref.dtype)


# ------------------------------ wrapper --------------------------------------
def detr_transformer(x, params, num_heads, matmul_dtype=jnp.float32):
    B, S, E = x.shape
    H = num_heads
    D = E // H
    F = params["w1"].shape[1]
    C = params["wc"].shape[1]
    P = ((C + 4 + 127) // 128) * 128          # lane-dense padded head width

    # ---- wrapper-side weight re-layout (done once, outside the kernel) ----
    wqkv = params["wqkv"]                     # (E, 3E), (in, out)
    bqkv = params["bqkv"][0]                  # (3E,)

    def head_w(w):                            # (E, E) -> (H, E, D)
        return w.reshape(E, H, D).transpose(1, 0, 2).astype(matmul_dtype)

    def head_b(b):                            # (E,) -> (H, 1, D), f32
        return b.reshape(H, 1, D).astype(jnp.float32)

    wq = head_w(wqkv[:, 0 * E:1 * E])
    wk = head_w(wqkv[:, 1 * E:2 * E])
    wv = head_w(wqkv[:, 2 * E:3 * E])
    bq = head_b(bqkv[0 * E:1 * E])
    bk = head_b(bqkv[1 * E:2 * E])
    bv = head_b(bqkv[2 * E:3 * E])

    wo = params["wo"].reshape(H, D, E).astype(matmul_dtype)   # per-head out-proj
    bo = params["bo"].astype(jnp.float32)                     # (1, E)
    w1 = params["w1"].astype(matmul_dtype)
    b1 = params["b1"].astype(jnp.float32)
    w2 = params["w2"].astype(matmul_dtype)
    b2 = params["b2"].astype(jnp.float32)

    # Fused, zero-padded (class | bbox) head: (E, P) and (1, P).
    wh = jnp.zeros((E, P), matmul_dtype)
    wh = wh.at[:, :C].set(params["wc"].astype(matmul_dtype))
    wh = wh.at[:, C:C + 4].set(params["wb"].astype(matmul_dtype))
    bh = jnp.zeros((1, P), jnp.float32)
    bh = bh.at[:, :C].set(params["bc"])
    bh = bh.at[:, C:C + 4].set(params["bb"])

    def rep(arr):   # whole-array block, constant index (weights / biases)
        nd = arr.ndim
        return pl.BlockSpec(arr.shape, lambda b, _n=nd: (0,) * _n)

    in_specs = [
        pl.BlockSpec((None, S, E), lambda b: (b, 0, 0)),      # x   (squeezed)
        pl.BlockSpec((None, S, E), lambda b: (0, 0, 0)),      # pos (squeezed)
        rep(wq), rep(wk), rep(wv), rep(bq), rep(bk), rep(bv),
        rep(wo), rep(bo),
        rep(w1), rep(b1), rep(w2), rep(b2),
        rep(wh), rep(bh),
    ]
    out_specs = pl.BlockSpec((None, S, P), lambda b: (b, 0, 0))

    kernel = functools.partial(detr_kernel, num_heads, matmul_dtype)
    head_out = pl.pallas_call(
        kernel,
        out_shape=jax.ShapeDtypeStruct((B, S, P), jnp.float32),
        grid_spec=pltpu.PrefetchScalarGridSpec(
            num_scalar_prefetch=0,
            grid=(B,),                       # >= 2 steps so v7x can use 2 TCs
            in_specs=in_specs,
            out_specs=out_specs),
        compiler_params=pltpu.CompilerParams(
            dimension_semantics=("parallel",),
            vmem_limit_bytes=32 * 1024 * 1024),
    )(x, params["pos"], wq, wk, wv, bq, bk, bv, wo, bo,
      w1, b1, w2, b2, wh, bh)

    # Slice the padded, lane-dense head output apart outside the kernel.
    logits = head_out[:, :, :C]
    bbox = head_out[:, :, C:C + 4]
    return logits, bbox


# --------------------------- pure-JAX reference -------------------------------
def reference(x, params, num_heads):
    B, S, E = x.shape
    D = E // num_heads
    h = x + params["pos"]
    qkv = h @ params["wqkv"] + params["bqkv"][0]
    q, k, v = jnp.split(qkv, 3, axis=-1)
    q = q.reshape(B, S, num_heads, D).transpose(0, 2, 1, 3)
    k = k.reshape(B, S, num_heads, D).transpose(0, 2, 1, 3)
    v = v.reshape(B, S, num_heads, D).transpose(0, 2, 1, 3)
    s = jnp.einsum("bhqd,bhkd->bhqk", q, k) / jnp.sqrt(jnp.float32(D))
    p = jax.nn.softmax(s, axis=-1)
    o = jnp.einsum("bhqk,bhkd->bhqd", p, v).transpose(0, 2, 1, 3).reshape(B, S, E)
    o = o @ params["wo"] + params["bo"][0]
    f = jax.nn.relu(o @ params["w1"] + params["b1"][0]) @ params["w2"] + params["b2"][0]
    logits = f @ params["wc"] + params["bc"][0]
    bbox = f @ params["wb"] + params["bb"][0]
    return logits, bbox


# ------------------------------ main ------------------------------------------
if __name__ == "__main__":
    # Small shapes consistent with the module (seq_len == num_queries).
    B, S, E = 2, 8, 32          # batch, seq(=num_queries), embed_dim
    H = 4                       # num_heads
    FF = 64                     # ff_dim
    C = 16                      # num_classes

    key = jax.random.PRNGKey(0)
    ks = jax.random.split(key, 16)
    scale = 0.05

    # Weights stored pre-transposed: (in_features, out_features).
    params = {
        "pos":  jax.random.normal(ks[0], (1, S, E), jnp.float32),
        "wqkv": scale * jax.random.normal(ks[1], (E, 3 * E), jnp.float32),
        "bqkv": scale * jax.random.normal(ks[2], (1, 3 * E), jnp.float32),
        "wo":   scale * jax.random.normal(ks[3], (E, E), jnp.float32),
        "bo":   scale * jax.random.normal(ks[4], (1, E), jnp.float32),
        "w1":   scale * jax.random.normal(ks[5], (E, FF), jnp.float32),
        "b1":   scale * jax.random.normal(ks[6], (1, FF), jnp.float32),
        "w2":   scale * jax.random.normal(ks[7], (FF, E), jnp.float32),
        "b2":   scale * jax.random.normal(ks[8], (1, E), jnp.float32),
        "wc":   scale * jax.random.normal(ks[9], (E, C), jnp.float32),
        "bc":   scale * jax.random.normal(ks[10], (1, C), jnp.float32),
        "wb":   scale * jax.random.normal(ks[11], (E, 4), jnp.float32),
        "bb":   scale * jax.random.normal(ks[12], (1, 4), jnp.float32),
    }

    x = jax.random.normal(ks[13], (B, S, E), jnp.float32)

    # bf16 MXU inputs + f32 accumulation (per v6e/v7x perf guidance).
    logits, bbox = detr_transformer(x, params, H, matmul_dtype=jnp.bfloat16)
    jax.block_until_ready((logits, bbox))

    logits_ref, bbox_ref = reference(x, params, H)
    assert logits.shape == (B, S, C) and bbox.shape == (B, S, 4)
    # Tolerance loosened for bf16 matmuls + approximate EUP reciprocal.
    assert jnp.allclose(logits, logits_ref, rtol=1e-2, atol=1e-2)
    assert jnp.allclose(bbox, bbox_ref, rtol=1e-2, atol=1e-2)

    print("KERNEL_OK")
</pallas_src>

<mosaic_0001>
module attributes {stable_mosaic.version = 11 : i64} {
  func.func @detr_kernel(%arg0: i32, %arg1: memref<1x8x32xf32, #tpu.memory_space<vmem>>, %arg2: memref<1x8x32xf32, #tpu.memory_space<vmem>>, %arg3: memref<4x32x8xbf16, #tpu.memory_space<vmem>>, %arg4: memref<4x32x8xbf16, #tpu.memory_space<vmem>>, %arg5: memref<4x32x8xbf16, #tpu.memory_space<vmem>>, %arg6: memref<4x1x8xf32, #tpu.memory_space<vmem>>, %arg7: memref<4x1x8xf32, #tpu.memory_space<vmem>>, %arg8: memref<4x1x8xf32, #tpu.memory_space<vmem>>, %arg9: memref<4x8x32xbf16, #tpu.memory_space<vmem>>, %arg10: memref<1x32xf32, #tpu.memory_space<vmem>>, %arg11: memref<32x64xbf16, #tpu.memory_space<vmem>>, %arg12: memref<1x64xf32, #tpu.memory_space<vmem>>, %arg13: memref<64x32xbf16, #tpu.memory_space<vmem>>, %arg14: memref<1x32xf32, #tpu.memory_space<vmem>>, %arg15: memref<32x128xbf16, #tpu.memory_space<vmem>>, %arg16: memref<1x128xf32, #tpu.memory_space<vmem>>, %arg17: memref<1x8x128xf32, #tpu.memory_space<vmem>>) attributes {dimension_semantics = [#tpu.dimension_semantics<parallel>], iteration_bounds = array<i64: 2>, scalar_prefetch = 0 : i64, scratch_operands = 0 : i64, tpu.core_type = #tpu.core_type<tc>, window_params = [{transform_indices = @transform_0, window_bounds = array<i64: 1, 8, 32>}, {pipeline_mode = #tpu.pipeline_mode<synchronous>, transform_indices = @transform_1, window_bounds = array<i64: 1, 8, 32>}, {pipeline_mode = #tpu.pipeline_mode<synchronous>, transform_indices = @transform_2, window_bounds = array<i64: 4, 32, 8>}, {pipeline_mode = #tpu.pipeline_mode<synchronous>, transform_indices = @transform_3, window_bounds = array<i64: 4, 32, 8>}, {pipeline_mode = #tpu.pipeline_mode<synchronous>, transform_indices = @transform_4, window_bounds = array<i64: 4, 32, 8>}, {pipeline_mode = #tpu.pipeline_mode<synchronous>, transform_indices = @transform_5, window_bounds = array<i64: 4, 1, 8>}, {pipeline_mode = #tpu.pipeline_mode<synchronous>, transform_indices = @transform_6, window_bounds = array<i64: 4, 1, 8>}, {pipeline_mode = #tpu.pipeline_mode<synchronous>, transform_indices = @transform_7, window_bounds = array<i64: 4, 1, 8>}, {pipeline_mode = #tpu.pipeline_mode<synchronous>, transform_indices = @transform_8, window_bounds = array<i64: 4, 8, 32>}, {pipeline_mode = #tpu.pipeline_mode<synchronous>, transform_indices = @transform_9, window_bounds = array<i64: 1, 32>}, {pipeline_mode = #tpu.pipeline_mode<synchronous>, transform_indices = @transform_10, window_bounds = array<i64: 32, 64>}, {pipeline_mode = #tpu.pipeline_mode<synchronous>, transform_indices = @transform_11, window_bounds = array<i64: 1, 64>}, {pipeline_mode = #tpu.pipeline_mode<synchronous>, transform_indices = @transform_12, window_bounds = array<i64: 64, 32>}, {pipeline_mode = #tpu.pipeline_mode<synchronous>, transform_indices = @transform_13, window_bounds = array<i64: 1, 32>}, {pipeline_mode = #tpu.pipeline_mode<synchronous>, transform_indices = @transform_14, window_bounds = array<i64: 32, 128>}, {pipeline_mode = #tpu.pipeline_mode<synchronous>, transform_indices = @transform_15, window_bounds = array<i64: 1, 128>}, {transform_indices = @transform_16, window_bounds = array<i64: 1, 8, 128>}]} {
    %c0 = arith.constant 0 : index
    %c0_0 = arith.constant 0 : index
    %c0_1 = arith.constant 0 : index
    %0 = vector.load %arg1[%c0, %c0_0, %c0_1] : memref<1x8x32xf32, #tpu.memory_space<vmem>>, vector<1x8x32xf32>
    %1 = vector.shape_cast %0 : vector<1x8x32xf32> to vector<8x32xf32>
    %c0_2 = arith.constant 0 : index
    %c0_3 = arith.constant 0 : index
    %c0_4 = arith.constant 0 : index
    %2 = vector.load %arg2[%c0_2, %c0_3, %c0_4] : memref<1x8x32xf32, #tpu.memory_space<vmem>>, vector<1x8x32xf32>
    %3 = vector.shape_cast %2 : vector<1x8x32xf32> to vector<8x32xf32>
    %4 = arith.addf %1, %3 : vector<8x32xf32>
    %5 = arith.truncf %4 : vector<8x32xf32> to vector<8x32xbf16>
    %6 = vector.shape_cast %5 : vector<8x32xbf16> to vector<1x8x32xbf16>
    %7 = vector.broadcast %6 : vector<1x8x32xbf16> to vector<4x8x32xbf16>
    %c0_5 = arith.constant 0 : index
    %c0_6 = arith.constant 0 : index
    %c0_7 = arith.constant 0 : index
    %8 = vector.load %arg3[%c0_5, %c0_6, %c0_7] : memref<4x32x8xbf16, #tpu.memory_space<vmem>>, vector<4x32x8xbf16>
    "tpu.trace_start"() <{level = 10 : i32, message = "hse,hed->hsd"}> : () -> ()
    %cst = arith.constant dense<0.000000e+00> : vector<4x8x8xf32>
    %9 = tpu.matmul %7, %8, %cst {dimension_numbers = #tpu.dot_dimension_numbers<[2], [1], [1], [2], [0, 0, 0, 1, 1, 2], [0], [0]>} : vector<4x8x32xbf16>, vector<4x32x8xbf16>, vector<4x8x8xf32> -> vector<4x8x8xf32>
    "tpu.trace_stop"() : () -> ()
    %c0_8 = arith.constant 0 : index
    %c0_9 = arith.constant 0 : index
    %c0_10 = arith.constant 0 : index
    %10 = vector.load %arg6[%c0_8, %c0_9, %c0_10] : memref<4x1x8xf32, #tpu.memory_space<vmem>>, vector<4x1x8xf32>
    %11 = vector.broadcast %10 : vector<4x1x8xf32> to vector<4x8x8xf32>
    %12 = arith.addf %9, %11 : vector<4x8x8xf32>
    %c0_11 = arith.constant 0 : index
    %c0_12 = arith.constant 0 : index
    %c0_13 = arith.constant 0 : index
    %13 = vector.load %arg4[%c0_11, %c0_12, %c0_13] : memref<4x32x8xbf16, #tpu.memory_space<vmem>>, vector<4x32x8xbf16>
    "tpu.trace_start"() <{level = 10 : i32, message = "hse,hed->hsd"}> : () -> ()
    %cst_14 = arith.constant dense<0.000000e+00> : vector<4x8x8xf32>
    %14 = tpu.matmul %7, %13, %cst_14 {dimension_numbers = #tpu.dot_dimension_numbers<[2], [1], [1], [2], [0, 0, 0, 1, 1, 2], [0], [0]>} : vector<4x8x32xbf16>, vector<4x32x8xbf16>, vector<4x8x8xf32> -> vector<4x8x8xf32>
    "tpu.trace_stop"() : () -> ()
    %c0_15 = arith.constant 0 : index
    %c0_16 = arith.constant 0 : index
    %c0_17 = arith.constant 0 : index
    %15 = vector.load %arg7[%c0_15, %c0_16, %c0_17] : memref<4x1x8xf32, #tpu.memory_space<vmem>>, vector<4x1x8xf32>
    %16 = vector.broadcast %15 : vector<4x1x8xf32> to vector<4x8x8xf32>
    %17 = arith.addf %14, %16 : vector<4x8x8xf32>
    %c0_18 = arith.constant 0 : index
    %c0_19 = arith.constant 0 : index
    %c0_20 = arith.constant 0 : index
    %18 = vector.load %arg5[%c0_18, %c0_19, %c0_20] : memref<4x32x8xbf16, #tpu.memory_space<vmem>>, vector<4x32x8xbf16>
    "tpu.trace_start"() <{level = 10 : i32, message = "hse,hed->hsd"}> : () -> ()
    %cst_21 = arith.constant dense<0.000000e+00> : vector<4x8x8xf32>
    %19 = tpu.matmul %7, %18, %cst_21 {dimension_numbers = #tpu.dot_dimension_numbers<[2], [1], [1], [2], [0, 0, 0, 1, 1, 2], [0], [0]>} : vector<4x8x32xbf16>, vector<4x32x8xbf16>, vector<4x8x8xf32> -> vector<4x8x8xf32>
    "tpu.trace_stop"() : () -> ()
    %c0_22 = arith.constant 0 : index
    %c0_23 = arith.constant 0 : index
    %c0_24 = arith.constant 0 : index
    %20 = vector.load %arg8[%c0_22, %c0_23, %c0_24] : memref<4x1x8xf32, #tpu.memory_space<vmem>>, vector<4x1x8xf32>
    %21 = vector.broadcast %20 : vector<4x1x8xf32> to vector<4x8x8xf32>
    %22 = arith.addf %19, %21 : vector<4x8x8xf32>
    %cst_25 = arith.constant 0.353553385 : f32
    %23 = vector.broadcast %cst_25 : f32 to vector<4x8x8xf32>
    %24 = arith.mulf %12, %23 : vector<4x8x8xf32>
    %25 = arith.truncf %24 : vector<4x8x8xf32> to vector<4x8x8xbf16>
    %26 = arith.truncf %17 : vector<4x8x8xf32> to vector<4x8x8xbf16>
    %27 = arith.truncf %22 : vector<4x8x8xf32> to vector<4x8x8xbf16>
    "tpu.trace_start"() <{level = 10 : i32, message = "hqd,hkd->hqk"}> : () -> ()
    %cst_26 = arith.constant dense<0.000000e+00> : vector<4x8x8xf32>
    %28 = tpu.matmul %25, %26, %cst_26 {dimension_numbers = #tpu.dot_dimension_numbers<[2], [2], [1], [1], [0, 0, 0, 1, 1, 1], [0], [0]>} : vector<4x8x8xbf16>, vector<4x8x8xbf16>, vector<4x8x8xf32> -> vector<4x8x8xf32>
    "tpu.trace_stop"() : () -> ()
    %cst_27 = arith.constant dense<0xFF800000> : vector<4x8xf32>
    %29 = vector.multi_reduction <maximumf>, %28, %cst_27 [2] : vector<4x8x8xf32> to vector<4x8xf32>
    %30 = vector.shape_cast %29 : vector<4x8xf32> to vector<4x8x1xf32>
    %31 = vector.broadcast %30 : vector<4x8x1xf32> to vector<4x8x8xf32>
    %32 = arith.subf %28, %31 : vector<4x8x8xf32>
    %33 = math.exp %32 : vector<4x8x8xf32>
    %cst_28 = arith.constant dense<0.000000e+00> : vector<4x8xf32>
    %34 = vector.multi_reduction <add>, %33, %cst_28 [2] : vector<4x8x8xf32> to vector<4x8xf32>
    %35 = vector.shape_cast %34 : vector<4x8xf32> to vector<4x8x1xf32>
    %36 = tpu.reciprocal %35 {approx = true} : vector<4x8x1xf32> -> vector<4x8x1xf32>
    %37 = vector.broadcast %36 : vector<4x8x1xf32> to vector<4x8x8xf32>
    %38 = arith.mulf %33, %37 : vector<4x8x8xf32>
    %39 = arith.truncf %38 : vector<4x8x8xf32> to vector<4x8x8xbf16>
    "tpu.trace_start"() <{level = 10 : i32, message = "hqk,hkd->hqd"}> : () -> ()
    %cst_29 = arith.constant dense<0.000000e+00> : vector<4x8x8xf32>
    %40 = tpu.matmul %39, %27, %cst_29 {dimension_numbers = #tpu.dot_dimension_numbers<[2], [1], [1], [2], [0, 0, 0, 1, 1, 2], [0], [0]>} : vector<4x8x8xbf16>, vector<4x8x8xbf16>, vector<4x8x8xf32> -> vector<4x8x8xf32>
    "tpu.trace_stop"() : () -> ()
    %41 = arith.truncf %40 : vector<4x8x8xf32> to vector<4x8x8xbf16>
    %c0_30 = arith.constant 0 : index
    %c0_31 = arith.constant 0 : index
    %c0_32 = arith.constant 0 : index
    %42 = vector.load %arg9[%c0_30, %c0_31, %c0_32] : memref<4x8x32xbf16, #tpu.memory_space<vmem>>, vector<4x8x32xbf16>
    "tpu.trace_start"() <{level = 10 : i32, message = "hsd,hde->hse"}> : () -> ()
    %cst_33 = arith.constant dense<0.000000e+00> : vector<4x8x32xf32>
    %43 = tpu.matmul %41, %42, %cst_33 {dimension_numbers = #tpu.dot_dimension_numbers<[2], [1], [1], [2], [0, 0, 0, 1, 1, 2], [0], [0]>} : vector<4x8x8xbf16>, vector<4x8x32xbf16>, vector<4x8x32xf32> -> vector<4x8x32xf32>
    "tpu.trace_stop"() : () -> ()
    %cst_34 = arith.constant dense<0.000000e+00> : vector<8x32xf32>
    %44 = vector.multi_reduction <add>, %43, %cst_34 [0] : vector<4x8x32xf32> to vector<8x32xf32>
    %c0_35 = arith.constant 0 : index
    %c0_36 = arith.constant 0 : index
    %45 = vector.load %arg10[%c0_35, %c0_36] : memref<1x32xf32, #tpu.memory_space<vmem>>, vector<1x32xf32>
    %46 = vector.broadcast %45 : vector<1x32xf32> to vector<8x32xf32>
    %47 = arith.addf %44, %46 : vector<8x32xf32>
    %48 = arith.truncf %47 : vector<8x32xf32> to vector<8x32xbf16>
    %c0_37 = arith.constant 0 : index
    %c0_38 = arith.constant 0 : index
    %49 = vector.load %arg11[%c0_37, %c0_38] : memref<32x64xbf16, #tpu.memory_space<vmem>>, vector<32x64xbf16>
    %cst_39 = arith.constant dense<0.000000e+00> : vector<8x64xf32>
    %50 = tpu.matmul %48, %49, %cst_39 {dimension_numbers = #tpu.dot_dimension_numbers<[1], [0], [0], [1], [0, 0, 1, 1], [], []>} : vector<8x32xbf16>, vector<32x64xbf16>, vector<8x64xf32> -> vector<8x64xf32>
    %c0_40 = arith.constant 0 : index
    %c0_41 = arith.constant 0 : index
    %51 = vector.load %arg12[%c0_40, %c0_41] : memref<1x64xf32, #tpu.memory_space<vmem>>, vector<1x64xf32>
    %52 = vector.broadcast %51 : vector<1x64xf32> to vector<8x64xf32>
    %53 = arith.addf %50, %52 : vector<8x64xf32>
    %cst_42 = arith.constant 0.000000e+00 : f32
    %54 = vector.broadcast %cst_42 : f32 to vector<8x64xf32>
    %55 = arith.maximumf %53, %54 : vector<8x64xf32>
    %56 = arith.truncf %55 : vector<8x64xf32> to vector<8x64xbf16>
    %c0_43 = arith.constant 0 : index
    %c0_44 = arith.constant 0 : index
    %57 = vector.load %arg13[%c0_43, %c0_44] : memref<64x32xbf16, #tpu.memory_space<vmem>>, vector<64x32xbf16>
    %cst_45 = arith.constant dense<0.000000e+00> : vector<8x32xf32>
    %58 = tpu.matmul %56, %57, %cst_45 {dimension_numbers = #tpu.dot_dimension_numbers<[1], [0], [0], [1], [0, 0, 1, 1], [], []>} : vector<8x64xbf16>, vector<64x32xbf16>, vector<8x32xf32> -> vector<8x32xf32>
    %c0_46 = arith.constant 0 : index
    %c0_47 = arith.constant 0 : index
    %59 = vector.load %arg14[%c0_46, %c0_47] : memref<1x32xf32, #tpu.memory_space<vmem>>, vector<1x32xf32>
    %60 = vector.broadcast %59 : vector<1x32xf32> to vector<8x32xf32>
    %61 = arith.addf %58, %60 : vector<8x32xf32>
    %62 = arith.truncf %61 : vector<8x32xf32> to vector<8x32xbf16>
    %c0_48 = arith.constant 0 : index
    %c0_49 = arith.constant 0 : index
    %63 = vector.load %arg15[%c0_48, %c0_49] : memref<32x128xbf16, #tpu.memory_space<vmem>>, vector<32x128xbf16>
    %cst_50 = arith.constant dense<0.000000e+00> : vector<8x128xf32>
    %64 = tpu.matmul %62, %63, %cst_50 {dimension_numbers = #tpu.dot_dimension_numbers<[1], [0], [0], [1], [0, 0, 1, 1], [], []>} : vector<8x32xbf16>, vector<32x128xbf16>, vector<8x128xf32> -> vector<8x128xf32>
    %c0_51 = arith.constant 0 : index
    %c0_52 = arith.constant 0 : index
    %65 = vector.load %arg16[%c0_51, %c0_52] : memref<1x128xf32, #tpu.memory_space<vmem>>, vector<1x128xf32>
    %66 = vector.broadcast %65 : vector<1x128xf32> to vector<8x128xf32>
    %67 = arith.addf %64, %66 : vector<8x128xf32>
    %c0_53 = arith.constant 0 : index
    %c0_54 = arith.constant 0 : index
    %c0_55 = arith.constant 0 : index
    %68 = vector.load %arg17[%c0_53, %c0_54, %c0_55] : memref<1x8x128xf32, #tpu.memory_space<vmem>>, vector<1x8x128xf32>
    %69 = vector.shape_cast %68 : vector<1x8x128xf32> to vector<8x128xf32>
    %70 = vector.shape_cast %67 : vector<8x128xf32> to vector<1x8x128xf32>
    tpu.vector_store %arg17[%c0_53, %c0_54, %c0_55], %70 {strides = array<i32>} : memref<1x8x128xf32, #tpu.memory_space<vmem>>, vector<1x8x128xf32>,
    return
  }
  func.func @transform_0(%arg0: i32) -> (i32, i32, i32) {
    %c0_i32 = arith.constant 0 : i32
    %c0_i32_0 = arith.constant 0 : i32
    %c0_i32_1 = arith.constant 0 : i32
    return %arg0, %c0_i32, %c0_i32_0 : i32, i32, i32
  }
  func.func @transform_1(%arg0: i32) -> (i32, i32, i32) {
    %c0_i32 = arith.constant 0 : i32
    %c0_i32_0 = arith.constant 0 : i32
    %c0_i32_1 = arith.constant 0 : i32
    %c0_i32_2 = arith.constant 0 : i32
    return %c0_i32, %c0_i32_0, %c0_i32_1 : i32, i32, i32
  }
  func.func @transform_2(%arg0: i32) -> (i32, i32, i32) {
    %c0_i32 = arith.constant 0 : i32
    %c0_i32_0 = arith.constant 0 : i32
    %c0_i32_1 = arith.constant 0 : i32
    %c0_i32_2 = arith.constant 0 : i32
    return %c0_i32, %c0_i32_0, %c0_i32_1 : i32, i32, i32
  }
  func.func @transform_3(%arg0: i32) -> (i32, i32, i32) {
    %c0_i32 = arith.constant 0 : i32
    %c0_i32_0 = arith.constant 0 : i32
    %c0_i32_1 = arith.constant 0 : i32
    %c0_i32_2 = arith.constant 0 : i32
    return %c0_i32, %c0_i32_0, %c0_i32_1 : i32, i32, i32
  }
  func.func @transform_4(%arg0: i32) -> (i32, i32, i32) {
    %c0_i32 = arith.constant 0 : i32
    %c0_i32_0 = arith.constant 0 : i32
    %c0_i32_1 = arith.constant 0 : i32
    %c0_i32_2 = arith.constant 0 : i32
    return %c0_i32, %c0_i32_0, %c0_i32_1 : i32, i32, i32
  }
  func.func @transform_5(%arg0: i32) -> (i32, i32, i32) {
    %c0_i32 = arith.constant 0 : i32
    %c0_i32_0 = arith.constant 0 : i32
    %c0_i32_1 = arith.constant 0 : i32
    %c0_i32_2 = arith.constant 0 : i32
    return %c0_i32, %c0_i32_0, %c0_i32_1 : i32, i32, i32
  }
  func.func @transform_6(%arg0: i32) -> (i32, i32, i32) {
    %c0_i32 = arith.constant 0 : i32
    %c0_i32_0 = arith.constant 0 : i32
    %c0_i32_1 = arith.constant 0 : i32
    %c0_i32_2 = arith.constant 0 : i32
    return %c0_i32, %c0_i32_0, %c0_i32_1 : i32, i32, i32
  }
  func.func @transform_7(%arg0: i32) -> (i32, i32, i32) {
    %c0_i32 = arith.constant 0 : i32
    %c0_i32_0 = arith.constant 0 : i32
    %c0_i32_1 = arith.constant 0 : i32
    %c0_i32_2 = arith.constant 0 : i32
    return %c0_i32, %c0_i32_0, %c0_i32_1 : i32, i32, i32
  }
  func.func @transform_8(%arg0: i32) -> (i32, i32, i32) {
    %c0_i32 = arith.constant 0 : i32
    %c0_i32_0 = arith.constant 0 : i32
    %c0_i32_1 = arith.constant 0 : i32
    %c0_i32_2 = arith.constant 0 : i32
    return %c0_i32, %c0_i32_0, %c0_i32_1 : i32, i32, i32
  }
  func.func @transform_9(%arg0: i32) -> (i32, i32) {
    %c0_i32 = arith.constant 0 : i32
    %c0_i32_0 = arith.constant 0 : i32
    %c0_i32_1 = arith.constant 0 : i32
    return %c0_i32, %c0_i32_0 : i32, i32
  }
  func.func @transform_10(%arg0: i32) -> (i32, i32) {
    %c0_i32 = arith.constant 0 : i32
    %c0_i32_0 = arith.constant 0 : i32
    %c0_i32_1 = arith.constant 0 : i32
    return %c0_i32, %c0_i32_0 : i32, i32
  }
  func.func @transform_11(%arg0: i32) -> (i32, i32) {
    %c0_i32 = arith.constant 0 : i32
    %c0_i32_0 = arith.constant 0 : i32
    %c0_i32_1 = arith.constant 0 : i32
    return %c0_i32, %c0_i32_0 : i32, i32
  }
  func.func @transform_12(%arg0: i32) -> (i32, i32) {
    %c0_i32 = arith.constant 0 : i32
    %c0_i32_0 = arith.constant 0 : i32
    %c0_i32_1 = arith.constant 0 : i32
    return %c0_i32, %c0_i32_0 : i32, i32
  }
  func.func @transform_13(%arg0: i32) -> (i32, i32) {
    %c0_i32 = arith.constant 0 : i32
    %c0_i32_0 = arith.constant 0 : i32
    %c0_i32_1 = arith.constant 0 : i32
    return %c0_i32, %c0_i32_0 : i32, i32
  }
  func.func @transform_14(%arg0: i32) -> (i32, i32) {
    %c0_i32 = arith.constant 0 : i32
    %c0_i32_0 = arith.constant 0 : i32
    %c0_i32_1 = arith.constant 0 : i32
    return %c0_i32, %c0_i32_0 : i32, i32
  }
  func.func @transform_15(%arg0: i32) -> (i32, i32) {
    %c0_i32 = arith.constant 0 : i32
    %c0_i32_0 = arith.constant 0 : i32
    %c0_i32_1 = arith.constant 0 : i32
    return %c0_i32, %c0_i32_0 : i32, i32
  }
  func.func @transform_16(%arg0: i32) -> (i32, i32, i32) {
    %c0_i32 = arith.constant 0 : i32
    %c0_i32_0 = arith.constant 0 : i32
    %c0_i32_1 = arith.constant 0 : i32
    return %arg0, %c0_i32, %c0_i32_0 : i32, i32, i32
  }
}

</mosaic_0001>

<bundles_post_ra>
// kernel: tpu_custom_call.1
= control target key start
LH: loop header
LB: loop body
LE: loop exit
PB: predicated region body
PF: predicated region fallthrough
CT: control target
= control target key end

     0   :  { %s3236_s0 = inlined_call_operand.vmem [shape: f32[2,8,32], index: 0, kind: input, shape index: {}]   ;;  %s3237_s1 = inlined_call_operand.vmem [shape: f32[1,8,32], index: 1, kind: input, shape index: {}]   ;;  %s3238_s2 = inlined_call_operand.vmem [shape: bf16[4,32,8], index: 2, kind: input, shape index: {}]   ;;  %s3239_s3 = inlined_call_operand.vmem [shape: bf16[4,32,8], index: 3, kind: input, shape index: {}]   ;;  %s3240_s4 = inlined_call_operand.vmem [shape: bf16[4,32,8], index: 4, kind: input, shape index: {}]   ;;  %s3241_s5 = inlined_call_operand.vmem [shape: f32[4,1,8], index: 5, kind: input, shape index: {}]   ;;  %s3242_s6 = inlined_call_operand.vmem [shape: f32[4,1,8], index: 6, kind: input, shape index: {}]   ;;  %s3243_s7 = inlined_call_operand.vmem [shape: f32[4,1,8], index: 7, kind: input, shape index: {}]   ;;  %s3244_s8 = inlined_call_operand.vmem [shape: bf16[4,8,32], index: 8, kind: input, shape index: {}]   ;;  %s3245_s9 = inlined_call_operand.vmem [shape: f32[1,32], index: 9, kind: input, shape index: {}]   ;;  %s3246_s10 = inlined_call_operand.vmem [shape: bf16[32,64], index: 10, kind: input, shape index: {}]   ;;  %s3247_s11 = inlined_call_operand.vmem [shape: f32[1,64], index: 11, kind: input, shape index: {}]   ;;  %s3248_s12 = inlined_call_operand.vmem [shape: bf16[64,32], index: 12, kind: input, shape index: {}]   ;;  %s3249_s13 = inlined_call_operand.vmem [shape: f32[1,32], index: 13, kind: input, shape index: {}]   ;;  %s3250_s14 = inlined_call_operand.vmem [shape: bf16[32,128], index: 14, kind: input, shape index: {}]   ;;  %s3251_s15 = inlined_call_operand.vmem [shape: f32[1,128], index: 15, kind: input, shape index: {}]   ;;  %s3252_s16 = inlined_call_operand.hbm [shape: f32[2,8,128], index: 16, kind: output, shape index: {}]  }
   0x1   :  { %3258 = sst [smem:[#allocation10_spill]] %s3236_s0 }
   0x2   :  { %21 = vsyncpa [#allocation3], 0 }
   0x3   :  { %23 = vsyncpa [#allocation3 + $0x1], 0  ;;  %s2809_s21 = smov 0   ;;  %s2811_s22 = smov 0  }
   0x4   :  { %s2813_s23 = smov 0   ;;  %s2815_s24 = smov 0  }
   0x5 LB: > { %3259 = sst [smem:[#allocation5_spill]] %s2707_s21  ;;  %s2830_s25 = sadd.s32 4294967295, %s2719_s24   ;;  %s2719_s24 = sphi %s2815_s24, %s3269_s24   ;;  %s2715_s23 = sphi %s2813_s23, %s3271_s23   ;;  %s2711_s22 = sphi %s2811_s22, %s3273_s22   ;;  %s2707_s21 = sphi %s2809_s21, %s3272_s21  }
   0x6   : > { %3260 = sst [smem:[#allocation6_spill]] %s2715_s23  ;;  %s2216_s26 = sadd.s32 4294967294, %s2719_s24  }
   0x7   : > { %s2834_s27 = sadd.s32 1, %s2719_s24   ;;  %s377_s28 = sadd.s32 1, %s2715_s23 }
   0x8   : > { %3261 = sst [smem:[#allocation7_spill]] %s2834_s27  ;;  %s374_s29 = ssub.s32 %s2719_s24, %s2834_s27 }
   0x9   : > { %p387_p0 = scmp.ne.s32.totalorder %s2715_s23, %s2711_s22  ;;  %p375_p1 = scmp.eq.s32.totalorder %s374_s29, 0 }
   0xa   : > { %p388_p2 = scmp.eq.s32.totalorder %s2830_s25, 1  ;;  %p393_p3 = scmp.ne.s32.totalorder %s2711_s22, %s2707_s21 }
   0xb   : > { %p394_p4 = scmp.eq.s32.totalorder %s2216_s26, 1  ;;  %p2219_p7 = scmp.ge.s32.totalorder %s2719_s24, 1 }
   0xc   : > { %s2845_s30 = scalar_select %p375_p1, %s2715_s23, %s377_s28  }
   0xd   : > { %p2847_p5 = por %p388_p2, %p387_p0  ;;  %p2851_p6 = por %p394_p4, %p393_p3 }
   0xe   : > { %3262 = sst [smem:[#allocation8_spill]] %s2845_s30  ;;  %p464_p8 = scmp.lt.s32.totalorder %s2719_s24, 3 }
   0xf   : > { %s3264_s17 = scalar_select %p2851_p6, 1, 0 }
  0x10   : > { %p465_p9 = pnand %p2219_p7, %p464_p8 }
  0x11   : > { %3265 = sst [smem:[#allocation9_spill]] %s3264_s17  ;;  %v2609_v0 = vld [vmem:[%s3238_s2] sm:$0xff] (!%p465_p9)   ;;  %v2721_v1 = vmov (!%p465_p9), 0.0   ;;  %v2610_v2 = vld [vmem:[%s3238_s2 + $0x10] sm:$0xff] (!%p465_p9)   ;;  %v2611_v3 = vld [vmem:[%s3238_s2 + $0x8] sm:$0xff] (!%p465_p9)   ;;  %vm2722_vm0 = vmmov (!%p465_p9), 0  }
  0x12   : > { %468 = sbr.rel (%p465_p9) target bundleno = 1909 (0x775), region = 84  ;;  %2372 = vmatprep.subr.bf16.mxu0 (!%p465_p9), %v2721_v1  ;;  %2380 = vmatprep.subr.bf16.mxu1 (!%p465_p9), %v2721_v1  ;;  %p513_p10 = scmp.lt.s32.totalorder (!%p465_p9), %s2830_s25, 1  ;;  %v2612_v4 = vld [vmem:[%s3238_s2 + $0x18] sm:$0xff] (!%p465_p9)   ;;  %v519_v5 = vld [vmem:[%s3237_s1] sm:$0xff] (!%p465_p9)  ;;  %vm578_vm1 = vcmask (!%p465_p9), 261120   ;;  %v2614_v9 = vld [vmem:[%s3238_s2 + $0x30] sm:$0xff] (!%p465_p9)  }
  0x13   : > { %2373 = vmatpush3.bf16.msra.mxu0 (!%p465_p9), %v2609_v0  ;;  %2376 = vmatprep.mubr.msk.bf16.mxu0 (!%p465_p9), %vm2722_vm0, %v2721_v1  ;;  %s3266_s27 = sld [smem:[#allocation10_spill]] (!%p465_p9)  ;;  %v2613_v8 = vld [vmem:[%s3238_s2 + $0x20] sm:$0xff] (!%p465_p9)   ;;  %v2615_v11 = vld [vmem:[%s3238_s2 + $0x28] sm:$0xff] (!%p465_p9)   ;;  %v2616_v12 = vld [vmem:[%s3238_s2 + $0x38] sm:$0xff] (!%p465_p9)   ;;  %vm1298_vm2 = vcmask (!%p465_p9), 64512   ;;  %vm1534_vm3 = vcmask (!%p465_p9), 1043456  }
  0x14   : > { %2381 = vmatpush3.bf16.msra.mxu1 (!%p465_p9), %v2610_v2  ;;  %2374 = vmatprep.subr.bf16.mxu0 (!%p465_p9), %v2721_v1  ;;  %v2617_v13 = vld [vmem:[%s3239_s3] sm:$0xff] (!%p465_p9)   ;;  %v2618_v14 = vld [vmem:[%s3239_s3 + $0x10] sm:$0xff] (!%p465_p9)   ;;  %v2619_v15 = vld [vmem:[%s3239_s3 + $0x8] sm:$0xff] (!%p465_p9)   ;;  %vm2031_vm4 = vcmask (!%p465_p9), 523264   ;;  %s510_s30 = sand.u32 (!%p465_p9), 1, %s2711_s22   ;;  %s2298_s28 = sshll.u32 (!%p465_p9), %s2830_s25, 7 }
  0x15   : > { %2382 = vmatprep.subr.bf16.mxu1 (!%p465_p9), %v2721_v1  ;;  %2384 = vmatprep.mubr.msk.bf16.mxu1 (!%p465_p9), %vm2722_vm0, %v2721_v1  ;;  %v2620_v16 = vld [vmem:[%s3239_s3 + $0x18] sm:$0xff] (!%p465_p9)   ;;  %v2621_v17 = vld [vmem:[%s3239_s3 + $0x20] sm:$0xff] (!%p465_p9)   ;;  %v2622_v18 = vld [vmem:[%s3239_s3 + $0x30] sm:$0xff] (!%p465_p9)   ;;  %s3194_s23 = scalar_lea.hbm (!%p465_p9), %s3252_s16, %s2298_s28 }
  0x16   : > { %v2623_v19 = vld [vmem:[%s3239_s3 + $0x28] sm:$0xff] (!%p465_p9)   ;;  %v2624_v20 = vld [vmem:[%s3239_s3 + $0x38] sm:$0xff] (!%p465_p9)   ;;  %v2625_v21 = vld [vmem:[%s3240_s4] sm:$0xff] (!%p465_p9)  }
  0x17   : > { %2375 = vmatpush3.bf16.msra.mxu0 (!%p465_p9), %v2611_v3  ;;  %v2626_v22 = vld [vmem:[%s3240_s4 + $0x10] sm:$0xff] (!%p465_p9)   ;;  %v2627_v23 = vld [vmem:[%s3240_s4 + $0x8] sm:$0xff] (!%p465_p9)   ;;  %v2628_v24 = vld [vmem:[%s3240_s4 + $0x18] sm:$0xff] (!%p465_p9)  }
  0x18   : > { %2383 = vmatpush3.bf16.msra.mxu1 (!%p465_p9), %v2612_v4  ;;  %2388 = vmatprep.subr.bf16.mxu0 (!%p465_p9), %v2721_v1  ;;  %v2629_v25 = vld [vmem:[%s3240_s4 + $0x20] sm:$0xff] (!%p465_p9)   ;;  %v2630_v26 = vld [vmem:[%s3240_s4 + $0x30] sm:$0xff] (!%p465_p9)   ;;  %v2631_v27 = vld [vmem:[%s3240_s4 + $0x28] sm:$0xff] (!%p465_p9)  }
  0x19   : > { %s514_s20 = scalar_select %p513_p10, %s2830_s25, 1  ;;  %2396 = vmatprep.subr.bf16.mxu1 %v2721_v1  ;;  %v2632_v28 = vld [vmem:[%s3240_s4 + $0x38] sm:$0xff]   ;;  %v2238_v45 = vld [vmem:[%s3242_s6] ss:$0 sm:$0xff]  ;;  %v2239_v46 = vld [vmem:[%s3242_s6 + $0x1] ss:$0 sm:$0xff] }
  0x1a   : > { %v2222_v47 = vld [vmem:[%s3241_s5] ss:$0 sm:$0xff]  ;;  %v2223_v48 = vld [vmem:[%s3241_s5 + $0x1] ss:$0 sm:$0xff]  ;;  %v2240_v2 = vld [vmem:[%s3242_s6 + $0x2] ss:$0 sm:$0xff] }
  0x1b   : > { %s2221_s26 = sshll.u32 %s514_s20, 3 }
  0x1c   : > { %s516_s17 = scalar_lea.vmem %s3266_s27, %s2221_s26  ;;  %s2144_s27 = scalar_lea.sflag [#allocation3], %s510_s30 }
  0x1d   : > { %v518_v6 = vld [vmem:[%s516_s17] sm:$0xff]  ;;  %s2220_s17 = sshll.u32 %s510_s30, 3 }
  0x1e   : > { %v520_v7 = vadd.f32 %v519_v5, %v518_v6  ;;  %v2241_v5 = vld [vmem:[%s3242_s6 + $0x3] ss:$0 sm:$0xff]  ;;  %v2224_v6 = vld [vmem:[%s3241_s5 + $0x2] ss:$0 sm:$0xff]  ;;  %s512_s29 = scalar_lea.vmem [#allocation2], %s2220_s17  ;;  %s2723_s17 = smov [#allocation2]  }
  0x1f   : > { %s2157_s18 = sshll.u32 %s512_s29, 4  ;;  %s2661_s21 = sshll.u32 %s2723_s17, 4  ;;  %s3196_s18 = int_to_ptr.vmem [resolvable:$true] %s2157_s18  ;;  %s2662_s21 = int_to_ptr.vmem [resolvable:$false] %s2661_s21 }
  0x20   : > { %v2893_v10 = vpack.c.bf16 %v520_v7, %v520_v7  ;;  %v2225_v7 = vld [vmem:[%s3241_s5 + $0x3] ss:$0 sm:$0xff]  ;;  %s2657_s25 = scalar_lea.vmem %s3196_s18, 128  ;;  %s2663_s26 = scalar_lea.vmem %s2662_s21, 256 }
  0x21   : > { %p2658_p11 = scmp.ne.s32.totalorder %s3196_s18, %s2657_s25  ;;  %p2664_p0 = scmp.lt.s32.totalorder %s3196_s18, %s2662_s21 }
  0x22   : > { %2377 = vmatmul.mubr.msk.bf16.vlgmr.msra.gmra.mrb[0].mxu0 %vm578_vm1, %v2893_v10  ;;  %2385 = vmatmul.mubr.msk.bf16.vlgmr.msra.gmra.mrb[0].mxu1 %vm578_vm1, %v2893_v10  ;;  %p2665_p1 = scmp.lt.s32.totalorder %s2663_s26, %s2657_s25 }
  0x23   : > { %2389 = vmatpush3.bf16.msra.mxu0 %v2613_v8  ;;  %2397 = vmatpush3.bf16.msra.mxu1 %v2614_v9  ;;  %p2659_p12 = pnand %p2658_p11, %p2847_p5 }
  0x24   : > { %2390 = vmatprep.subr.bf16.mxu0 %v2721_v1  ;;  %2398 = vmatprep.subr.bf16.mxu1 %v2721_v1  ;;  %p2666_p2 = por %p2665_p1, %p2664_p0 }
  0x25   : > { %2392 = vmatprep.mubr.msk.bf16.mxu0 %vm2722_vm0, %v2721_v1  ;;  %2400 = vmatprep.mubr.msk.bf16.mxu1 %vm2722_vm0, %v2721_v1  ;;  %p2660_p13 = pneg %p2659_p12 }
  0x27   : > { %2391 = vmatpush3.bf16.msra.mxu0 %v2615_v11  ;;  %2399 = vmatpush3.bf16.msra.mxu1 %v2616_v12  ;;  %p2667_p3 = pnand %p2666_p2, %p2660_p13 }
  0x28   : > { %2404 = vmatprep.subr.bf16.mxu0 %v2721_v1  ;;  %2412 = vmatprep.subr.bf16.mxu1 %v2721_v1 }
  0x2a   : > { %2393 = vmatmul.mubr.msk.bf16.vlgmr.msra.gmra.mrb[4].mxu0 %vm578_vm1, %v2893_v10  ;;  %2401 = vmatmul.mubr.msk.bf16.vlgmr.msra.gmra.mrb[4].mxu1 %vm578_vm1, %v2893_v10 }
  0x2b   : > { %2405 = vmatpush3.bf16.msra.mxu0 %v2617_v13  ;;  %2413 = vmatpush3.bf16.msra.mxu1 %v2618_v14 }
  0x2c   : > { %2406 = vmatprep.subr.bf16.mxu0 %v2721_v1  ;;  %2414 = vmatprep.subr.bf16.mxu1 %v2721_v1 }
  0x2d   : > { %2408 = vmatprep.mubr.msk.bf16.mxu0 %vm2722_vm0, %v2721_v1  ;;  %2416 = vmatprep.mubr.msk.bf16.mxu1 %vm2722_vm0, %v2721_v1 }
  0x2f   : > { %2407 = vmatpush3.bf16.msra.mxu0 %v2619_v15  ;;  %2415 = vmatpush3.bf16.msra.mxu1 %v2620_v16 }
  0x30   : > { %2420 = vmatprep.subr.bf16.mxu0 %v2721_v1  ;;  %2428 = vmatprep.subr.bf16.mxu1 %v2721_v1 }
  0x32   : > { %2409 = vmatmul.mubr.msk.bf16.vlgmr.msra.gmra.mrb[8].mxu0 %vm578_vm1, %v2893_v10  ;;  %2417 = vmatmul.mubr.msk.bf16.vlgmr.msra.gmra.mrb[8].mxu1 %vm578_vm1, %v2893_v10 }
  0x33   : > { %2421 = vmatpush3.bf16.msra.mxu0 %v2621_v17  ;;  %2429 = vmatpush3.bf16.msra.mxu1 %v2622_v18 }
  0x34   : > { %2422 = vmatprep.subr.bf16.mxu0 %v2721_v1  ;;  %2430 = vmatprep.subr.bf16.mxu1 %v2721_v1 }
  0x35   : > { %2424 = vmatprep.mubr.msk.bf16.mxu0 %vm2722_vm0, %v2721_v1  ;;  %2432 = vmatprep.mubr.msk.bf16.mxu1 %vm2722_vm0, %v2721_v1 }
  0x37   : > { %2423 = vmatpush3.bf16.msra.mxu0 %v2623_v19  ;;  %2431 = vmatpush3.bf16.msra.mxu1 %v2624_v20 }
  0x38   : > { %2436 = vmatprep.subr.bf16.mxu0 %v2721_v1  ;;  %2444 = vmatprep.subr.bf16.mxu1 %v2721_v1 }
  0x3a   : > { %2425 = vmatmul.mubr.msk.bf16.vlgmr.msra.gmra.mrb[12].mxu0 %vm578_vm1, %v2893_v10  ;;  %2433 = vmatmul.mubr.msk.bf16.vlgmr.msra.gmra.mrb[12].mxu1 %vm578_vm1, %v2893_v10 }
  0x3b   : > { %2437 = vmatpush3.bf16.msra.mxu0 %v2625_v21  ;;  %2440 = vmatprep.mubr.msk.bf16.mxu0 %vm2722_vm0, %v2721_v1 }
  0x3c   : > { %2438 = vmatprep.subr.bf16.mxu0 %v2721_v1  ;;  %2448 = vmatprep.mubr.msk.bf16.mxu1 %vm2722_vm0, %v2721_v1 }
  0x3d   : > { %2445 = vmatpush3.bf16.msra.mxu1 %v2626_v22 }
  0x3e   : > { %2446 = vmatprep.subr.bf16.mxu1 %v2721_v1 }
  0x3f   : > { %2439 = vmatpush3.bf16.msra.mxu0 %v2627_v23 }
  0x40   : > { %2452 = vmatprep.subr.bf16.mxu0 %v2721_v1 }
  0x41   : > { %2447 = vmatpush3.bf16.msra.mxu1 %v2628_v24 }
  0x42   : > { %2441 = vmatmul.mubr.msk.bf16.vlgmr.msra.gmra.mrb[16].mxu0 %vm578_vm1, %v2893_v10  ;;  %2460 = vmatprep.subr.bf16.mxu1 %v2721_v1 }
  0x43   : > { %2456 = vmatprep.mubr.msk.bf16.mxu0 %vm2722_vm0, %v2721_v1  ;;  %2453 = vmatpush3.bf16.msra.mxu0 %v2629_v25 }
  0x44   : > { %2449 = vmatmul.mubr.msk.bf16.vlgmr.msra.gmra.mrb[16].mxu1 %vm578_vm1, %v2893_v10  ;;  %2454 = vmatprep.subr.bf16.mxu0 %v2721_v1 }
  0x45   : > { %2461 = vmatpush3.bf16.msra.mxu1 %v2630_v26  ;;  %2464 = vmatprep.mubr.msk.bf16.mxu1 %vm2722_vm0, %v2721_v1 }
  0x46   : > { %2462 = vmatprep.subr.bf16.mxu1 %v2721_v1 }
  0x47   : > { %2455 = vmatpush3.bf16.msra.mxu0 %v2631_v27 }
  0x48   : > { %2468 = vmatprep.subr.bf16.mxu0 %v2721_v1 }
  0x49   : > { %2463 = vmatpush3.bf16.msra.mxu1 %v2632_v28 }
  0x4a   : > { %2474 = vmatprep.subr.bf16.mxu1 %v2721_v1  ;;  %2457 = vmatmul.mubr.msk.bf16.vlgmr.msra.gmra.mrb[20].mxu0 %vm578_vm1, %v2893_v10 }
  0x4b   : > { %2470 = vmatprep.mubr.msk.bf16.mxu0 %vm2722_vm0, %v2721_v1 }
  0x4c   : > { %2465 = vmatmul.mubr.msk.bf16.vlgmr.msra.gmra.mrb[20].mxu1 %vm578_vm1, %v2893_v10 }
  0x4d   : > { %2476 = vmatprep.mubr.msk.bf16.mxu1 %vm2722_vm0, %v2721_v1 }
  0xf5   : > { %v616_v29 = vpop.f32.mrb[0].mxu0  ;;  %v668_v30 = vpop.f32.mrb[0].mxu1 }
  0xf6   : > { %v2378_v31 = vpop.f32.mrb[1].mxu0  ;;  %v2386_v32 = vpop.f32.mrb[1].mxu1  ;;  %v617_v55 = vadd.f32 %v2222_v47, %v616_v29  ;;  %v669_v56 = vadd.f32 %v2223_v48, %v668_v30  ;;  %v2254_v30 = vld [vmem:[%s3243_s7] ss:$0 sm:$0xff] }
  0xf7   : > { %v619_v33 = vpop.f32.mrb[2].mxu0  ;;  %v671_v34 = vpop.f32.mrb[2].mxu1  ;;  %v2255_v32 = vld [vmem:[%s3243_s7 + $0x1] ss:$0 sm:$0xff] }
  0xf8   : > { %v2379_v35 = vpop.f32.mrb[3].mxu0  ;;  %v2387_v36 = vpop.f32.mrb[3].mxu1  ;;  %v1282_v3 = vmul.f32 0.35355338, %v617_v55  ;;  %v1283_v4 = vmul.f32 0.35355338, %v669_v56 }
  0xfa   : > { %v1286_v14 = vpack.c.bf16 %v1282_v3, %v1282_v3  ;;  %v1287_v15 = vpack.c.bf16 %v1283_v4, %v1283_v4 }
  0xfd   : > { %v720_v37 = vpop.f32.mrb[4].mxu0  ;;  %v772_v38 = vpop.f32.mrb[4].mxu1 }
  0xfe   : > { %v2394_v39 = vpop.f32.mrb[5].mxu0  ;;  %v2402_v40 = vpop.f32.mrb[5].mxu1  ;;  %v721_v18 = vadd.f32 %v2224_v6, %v720_v37  ;;  %v773_v19 = vadd.f32 %v2225_v7, %v772_v38 }
  0xff   : > { %v723_v41 = vpop.f32.mrb[6].mxu0  ;;  %v775_v42 = vpop.f32.mrb[6].mxu1 }
 0x100   : > { %v2395_v43 = vpop.f32.mrb[7].mxu0  ;;  %v2403_v44 = vpop.f32.mrb[7].mxu1  ;;  %v1284_v26 = vmul.f32 0.35355338, %v721_v18  ;;  %v1285_v27 = vmul.f32 0.35355338, %v773_v19 }
 0x102   : > { %v1288_v28 = vpack.c.bf16 %v1284_v26, %v1284_v26  ;;  %v1289_v29 = vpack.c.bf16 %v1285_v27, %v1285_v27 }
 0x105   : > { %v868_v49 = vpop.f32.mrb[8].mxu0  ;;  %v920_v50 = vpop.f32.mrb[8].mxu1 }
 0x106   : > { %v869_v51 = vadd.f32 %v2238_v45, %v868_v49  ;;  %v921_v52 = vadd.f32 %v2239_v46, %v920_v50  ;;  %v2410_v53 = vpop.f32.mrb[9].mxu0  ;;  %v2418_v54 = vpop.f32.mrb[9].mxu1 }
 0x107   : > { %v871_v57 = vpop.f32.mrb[10].mxu0  ;;  %v923_v58 = vpop.f32.mrb[10].mxu1 }
 0x108   : > { %v1290_v59 = vpack.c.bf16 %v869_v51, %v869_v51  ;;  %v1291_v60 = vpack.c.bf16 %v921_v52, %v921_v52  ;;  %v2411_v61 = vpop.f32.mrb[11].mxu0  ;;  %v2419_v62 = vpop.f32.mrb[11].mxu1 }
 0x10a   : > { %v1303_v63 = vsel %vm1298_vm2, %v1290_v59, 0  ;;  %v1349_v0 = vsel %vm1298_vm2, %v1291_v60, 0 }
 0x10b   : > { %2469 = vmatpush3.bf16.xpose.msra.mxu0 %v1303_v63  ;;  %2475 = vmatpush3.bf16.xpose.msra.mxu1 %v1349_v0 }
 0x10c   : > { %2480 = vmatprep.subr.bf16.mxu0 %v2721_v1  ;;  %2486 = vmatprep.subr.bf16.mxu1 %v2721_v1 }
 0x10d   : > { %v972_v8 = vpop.f32.mrb[12].mxu0  ;;  %v1024_v9 = vpop.f32.mrb[12].mxu1 }
 0x10e   : > { %v973_v10 = vadd.f32 %v2240_v2, %v972_v8  ;;  %v1025_v11 = vadd.f32 %v2241_v5, %v1024_v9  ;;  %v2426_v12 = vpop.f32.mrb[13].mxu0  ;;  %v2434_v13 = vpop.f32.mrb[13].mxu1 }
 0x10f   : > { %v975_v16 = vpop.f32.mrb[14].mxu0  ;;  %v1027_v17 = vpop.f32.mrb[14].mxu1 }
 0x110   : > { %v1292_v20 = vpack.c.bf16 %v973_v10, %v973_v10  ;;  %v1293_v21 = vpack.c.bf16 %v1025_v11, %v1025_v11  ;;  %v2427_v22 = vpop.f32.mrb[15].mxu0  ;;  %v2435_v23 = vpop.f32.mrb[15].mxu1 }
 0x112   : > { %v1395_v24 = vsel %vm1298_vm2, %v1292_v20, 0  ;;  %v1441_v25 = vsel %vm1298_vm2, %v1293_v21, 0  ;;  %2471 = vmatmul.mubr.msk.bf16.vlgmr.msra.gmra.mrb[24].mxu0 %vm1298_vm2, %v1286_v14  ;;  %2477 = vmatmul.mubr.msk.bf16.vlgmr.msra.gmra.mrb[24].mxu1 %vm1298_vm2, %v1287_v15 }
 0x113   : > { %2481 = vmatpush3.bf16.xpose.msra.mxu0 %v1395_v24  ;;  %2487 = vmatpush3.bf16.xpose.msra.mxu1 %v1441_v25 }
 0x114   : > { %2482 = vmatprep.mubr.msk.bf16.mxu0 %vm2722_vm0, %v2721_v1  ;;  %2488 = vmatprep.mubr.msk.bf16.mxu1 %vm2722_vm0, %v2721_v1 }
 0x115   : > { %2492 = vmatprep.subr.bf16.mxu0 %v2721_v1  ;;  %2498 = vmatprep.subr.bf16.mxu1 %v2721_v1  ;;  %v1120_v31 = vpop.f32.mrb[16].mxu0 }
 0x116   : > { %v1121_v33 = vadd.f32 %v2254_v30, %v1120_v31  ;;  %v2442_v34 = vpop.f32.mrb[17].mxu0 }
 0x117   : > { %v1123_v35 = vpop.f32.mrb[18].mxu0  ;;  %v1172_v36 = vpop.f32.mrb[16].mxu1 }
 0x118   : > { %v1294_v37 = vpack.c.bf16 %v1121_v33, %v1121_v33  ;;  %v2443_v38 = vpop.f32.mrb[19].mxu0  ;;  %v1173_v39 = vadd.f32 %v2255_v32, %v1172_v36  ;;  %v2450_v40 = vpop.f32.mrb[17].mxu1  ;;  %v2256_v33 = vld [vmem:[%s3243_s7 + $0x2] ss:$0 sm:$0xff]  ;;  %v2257_v36 = vld [vmem:[%s3243_s7 + $0x3] ss:$0 sm:$0xff] }
 0x119   : > { %v1175_v41 = vpop.f32.mrb[18].mxu1 }
 0x11a   : > { %2483 = vmatmul.mubr.msk.bf16.vlgmr.msra.gmra.mrb[28].mxu0 %vm1298_vm2, %v1288_v28  ;;  %2489 = vmatmul.mubr.msk.bf16.vlgmr.msra.gmra.mrb[28].mxu1 %vm1298_vm2, %v1289_v29  ;;  %v1536_v42 = vsel %vm1534_vm3, %v1294_v37, 0  ;;  %v1295_v43 = vpack.c.bf16 %v1173_v39, %v1173_v39  ;;  %v2451_v44 = vpop.f32.mrb[19].mxu1 }
 0x11b   : > { %2494 = vmatprep.mubr.msk.bf16.mxu0 %vm2722_vm0, %v2721_v1  ;;  %2500 = vmatprep.mubr.msk.bf16.mxu1 %vm2722_vm0, %v2721_v1 }
 0x11c   : > { %2493 = vmatpush3.bf16.msra.mxu0 %v1536_v42  ;;  %v1582_v45 = vsel %vm1534_vm3, %v1295_v43, 0 }
 0x11d   : > { %2504 = vmatprep.subr.bf16.mxu0 %v2721_v1  ;;  %2499 = vmatpush3.bf16.msra.mxu1 %v1582_v45  ;;  %v3071_v46 = vpop.f32.mrb[20].mxu0 }
 0x11e   : > { %2510 = vmatprep.subr.bf16.mxu1 %v2721_v1  ;;  %v2458_v48 = vpop.f32.mrb[21].mxu0  ;;  %v1225_v34 = vadd.f32 %v2256_v33, %v3071_v46 }
 0x11f   : > { %v3073_v47 = vpop.f32.mrb[20].mxu1  ;;  %v1227_v50 = vpop.f32.mrb[22].mxu0 }
 0x120   : > { %v2466_v49 = vpop.f32.mrb[21].mxu1  ;;  %v2459_v52 = vpop.f32.mrb[23].mxu0  ;;  %v1296_v38 = vpack.c.bf16 %v1225_v34, %v1225_v34  ;;  %v1277_v39 = vadd.f32 %v2257_v36, %v3073_v47  ;;  %v1720_v47 = vld [vmem:[%s3244_s8] sm:$0xf] }
 0x121   : > { %v1279_v51 = vpop.f32.mrb[22].mxu1 }
 0x122   : > { %v2467_v53 = vpop.f32.mrb[23].mxu1  ;;  %v1628_v44 = vsel %vm1534_vm3, %v1296_v38, 0  ;;  %v1297_v45 = vpack.c.bf16 %v1277_v39, %v1277_v39 }
 0x123   : > { %v1728_v53 = vsel %vm1534_vm3, %v1720_v47, 0 }
 0x124   : > { %v1674_v50 = vsel %vm1534_vm3, %v1297_v45, 0 }
 0x1e5   : > { %v1339_v54 = vpop.f32.mrb[24].mxu0  ;;  %v1385_v55 = vpop.f32.mrb[24].mxu1 }
 0x1e6   : > { %v2472_v56 = vpop.f32.mrb[25].mxu0  ;;  %v2478_v57 = vpop.f32.mrb[25].mxu1  ;;  %v1483_v58 = vsel %vm1298_vm2, %v1339_v54, -inf  ;;  %v1486_v63 = vsel %vm1298_vm2, %v1385_v55, -inf }
 0x1e7   : > { %v1388_v59 = vpop.f32.mrb[26].mxu1  ;;  %1484 = vmax.xlane.f32.xlu0 %v1483_v58  ;;  %v1342_v60 = vpop.f32.mrb[26].mxu0  ;;  %v1721_v57 = vld [vmem:[%s3244_s8 + $0x4] sm:$0xf] }
 0x1e8   : > { %v2473_v61 = vpop.f32.mrb[27].mxu0  ;;  %v2479_v62 = vpop.f32.mrb[27].mxu1  ;;  %v1774_v58 = vsel %vm1534_vm3, %v1721_v57, 0  ;;  %v1722_v59 = vld [vmem:[%s3244_s8 + $0x8] sm:$0xf] }
 0x1eb   : > { %1487 = vmax.xlane.f32.xlu0 %v1486_v63  ;;  %v1820_v63 = vsel %vm1534_vm3, %v1722_v59, 0 }
 0x1ed   : > { %v1431_v0 = vpop.f32.mrb[28].mxu0  ;;  %v1477_v2 = vpop.f32.mrb[28].mxu1 }
 0x1ee   : > { %v2484_v3 = vpop.f32.mrb[29].mxu0  ;;  %v2490_v4 = vpop.f32.mrb[29].mxu1  ;;  %v1489_v5 = vsel %vm1298_vm2, %v1431_v0, -inf  ;;  %v1492_v10 = vsel %vm1298_vm2, %v1477_v2, -inf }
 0x1ef   : > { %v1480_v6 = vpop.f32.mrb[30].mxu1  ;;  %1490 = vmax.xlane.f32.xlu1 %v1489_v5  ;;  %v1434_v7 = vpop.f32.mrb[30].mxu0 }
 0x1f0   : > { %v2485_v8 = vpop.f32.mrb[31].mxu0  ;;  %v2491_v9 = vpop.f32.mrb[31].mxu1 }
 0x1f3   : > { %1493 = vmax.xlane.f32.xlu1 %v1492_v10 }
 0x274   : > { %v1485_v11 = vpop.xlane.xlu0 %1484 }
 0x275   : > { %v1495_v12 = vsub.f32 %v1339_v54, %v1485_v11 }
 0x277   : > { %v1499_v13 = vmul.f32 1.442695, %v1495_v12 }
 0x278   : > { %v1488_v14 = vpop.xlane.xlu0 %1487 }
 0x279   : > { %2641 = vpow2.f32 %v1499_v13  ;;  %v1496_v15 = vsub.f32 %v1385_v55, %v1488_v14 }
 0x27b   : > { %v1501_v16 = vmul.f32 1.442695, %v1496_v15 }
 0x27c   : > { %v1491_v17 = vpop.xlane.xlu1 %1490 }
 0x27d   : > { %2643 = vpow2.f32 %v1501_v16  ;;  %v1497_v18 = vsub.f32 %v1431_v0, %v1491_v17 }
 0x27f   : > { %v1503_v19 = vmul.f32 1.442695, %v1497_v18 }
 0x280   : > { %v1494_v20 = vpop.xlane.xlu1 %1493 }
 0x281   : > { %2645 = vpow2.f32 %v1503_v19  ;;  %v1498_v21 = vsub.f32 %v1477_v2, %v1494_v20  ;;  %v1723_v2 = vld [vmem:[%s3244_s8 + $0xc] sm:$0xf]  ;;  %v2633_v20 = vld [vmem:[%s3246_s10] sm:$0xff]  }
 0x282   : > { %v1866_v7 = vsel %vm1534_vm3, %v1723_v2, 0 }
 0x283   : > { %v2642_v22 = vpop.eup %2641  ;;  %v1505_v23 = vmul.f32 1.442695, %v1498_v21  ;;  %v2634_v21 = vld [vmem:[%s3246_s10 + $0x8] sm:$0xff]  }
 0x284   : > { %v1507_v24 = vsel %vm1298_vm2, %v2642_v22, 0.0 }
 0x285   : > { %2647 = vpow2.f32 %v1505_v23  ;;  %1508 = vadd.xlane.f32.xlu0 %v1507_v24  ;;  %v2636_v23 = vld [vmem:[%s3248_s12 + $0x8] sm:$0xff]  }
 0x287   : > { %v2644_v25 = vpop.eup %2643 }
 0x288   : > { %v1510_v26 = vsel %vm1298_vm2, %v2644_v25, 0.0 }
 0x289   : > { %1511 = vadd.xlane.f32.xlu1 %v1510_v26 }
 0x28b   : > { %v2646_v27 = vpop.eup %2645 }
 0x28c   : > { %v1513_v28 = vsel %vm1298_vm2, %v2646_v27, 0.0 }
 0x28d   : > { %1514 = vadd.xlane.f32.xlu0 %v1513_v28 }
 0x28f   : > { %v2648_v29 = vpop.eup %2647 }
 0x290   : > { %v1516_v30 = vsel %vm1298_vm2, %v2648_v29, 0.0 }
 0x291   : > { %1517 = vadd.xlane.f32.xlu1 %v1516_v30 }
 0x312   : > { %v1509_v31 = vpop.xlane.xlu0 %1508 }
 0x313   : > { %2649 = vrcp.f32 %v1509_v31 }
 0x316   : > { %v1512_v32 = vpop.xlane.xlu1 %1511 }
 0x317   : > { %2651 = vrcp.f32 %v1512_v32 }
 0x31a   : > { %v1515_v35 = vpop.xlane.xlu0 %1514 }
 0x31b   : > { %2653 = vrcp.f32 %v1515_v35 }
 0x31d   : > { %v2650_v37 = vpop.eup %2649 }
 0x31e   : > { %v1523_v40 = vmul.f32 %v2650_v37, %v2642_v22  ;;  %v1518_v41 = vpop.xlane.xlu1 %1517  ;;  %v2635_v22 = vld [vmem:[%s3248_s12] sm:$0xff]  }
 0x31f   : > { %2655 = vrcp.f32 %v1518_v41 }
 0x320   : > { %v1527_v42 = vpack.c.bf16 %v1523_v40, %v1523_v40 }
 0x321   : > { %v2652_v43 = vpop.eup %2651 }
 0x322   : > { %v1524_v48 = vmul.f32 %v2652_v43, %v2644_v25  ;;  %2495 = vmatmul.mubr.msk.bf16.vlgmr.msra.gmra.mrb[32].mxu0 %vm1298_vm2, %v1527_v42  ;;  %v2282_v43 = vld [vmem:[%s3245_s9] ss:$0 sm:$0xff] }
 0x323   : > { %2505 = vmatpush3.bf16.msra.mxu0 %v1628_v44  ;;  %2506 = vmatprep.mubr.msk.bf16.mxu0 %vm2722_vm0, %v2721_v1 }
 0x324   : > { %v1528_v46 = vpack.c.bf16 %v1524_v48, %v1524_v48  ;;  %2516 = vmatprep.subr.bf16.mxu0 %v2721_v1 }
 0x325   : > { %v2654_v49 = vpop.eup %2653 }
 0x326   : > { %v1525_v51 = vmul.f32 %v2654_v49, %v2646_v27  ;;  %2501 = vmatmul.mubr.msk.bf16.vlgmr.msra.gmra.mrb[32].mxu1 %vm1298_vm2, %v1528_v46 }
 0x327   : > { %2511 = vmatpush3.bf16.msra.mxu1 %v1674_v50  ;;  %2512 = vmatprep.mubr.msk.bf16.mxu1 %vm2722_vm0, %v2721_v1  ;;  %v2637_v50 = vld [vmem:[%s3248_s12 + $0x10] sm:$0xff]  }
 0x328   : > { %v1529_v52 = vpack.c.bf16 %v1525_v51, %v1525_v51  ;;  %2522 = vmatprep.subr.bf16.mxu1 %v2721_v1  ;;  %v2638_v51 = vld [vmem:[%s3248_s12 + $0x18] sm:$0xff]  }
 0x329   : > { %v2656_v54 = vpop.eup %2655 }
 0x32a   : > { %v1526_v55 = vmul.f32 %v2656_v54, %v2648_v29  ;;  %2507 = vmatmul.mubr.msk.bf16.vlgmr.msra.gmra.mrb[36].mxu0 %vm1298_vm2, %v1529_v52  ;;  %v2639_v52 = vld [vmem:[%s3250_s14] sm:$0xff]  }
 0x32b   : > { %2517 = vmatpush3.bf16.msra.mxu0 %v1728_v53  ;;  %2518 = vmatprep.mubr.msk.bf16.mxu0 %vm2722_vm0, %v2721_v1  ;;  %v2283_v53 = vld [vmem:[%s3247_s11] ss:$0 sm:$0xff] }
 0x32c   : > { %v1530_v56 = vpack.c.bf16 %v1526_v55, %v1526_v55  ;;  %2528 = vmatprep.subr.bf16.mxu0 %v2721_v1 }
 0x32e   : > { %2513 = vmatmul.mubr.msk.bf16.vlgmr.msra.gmra.mrb[36].mxu1 %vm1298_vm2, %v1530_v56 }
 0x32f   : > { %2524 = vmatprep.mubr.msk.bf16.mxu1 %vm2722_vm0, %v2721_v1  ;;  %2523 = vmatpush3.bf16.msra.mxu1 %v1774_v58 }
 0x330   : > { %2534 = vmatprep.subr.bf16.mxu1 %v2721_v1 }
 0x3f5   : > { %v1572_v60 = vpop.f32.mrb[32].mxu0 }
 0x3f6   : > { %v1716_v61 = vpack.c.bf16 %v1572_v60, %v1572_v60  ;;  %v2496_v62 = vpop.f32.mrb[33].mxu0 }
 0x3f7   : > { %v1575_v0 = vpop.f32.mrb[34].mxu0 }
 0x3f8   : > { %v2497_v3 = vpop.f32.mrb[35].mxu0  ;;  %2519 = vmatmul.mubr.msk.bf16.vlgmr.msra.gmra.mrb[40].mxu0 %vm1298_vm2, %v1716_v61  ;;  %v2640_v61 = vld [vmem:[%s3250_s14 + $0x8] sm:$0xff]  }
 0x3f9   : > { %v1618_v4 = vpop.f32.mrb[32].mxu1  ;;  %2529 = vmatpush3.bf16.msra.mxu0 %v1820_v63  ;;  %2530 = vmatprep.mubr.msk.bf16.mxu0 %vm2722_vm0, %v2721_v1 }
 0x3fa   : > { %v1717_v5 = vpack.c.bf16 %v1618_v4, %v1618_v4  ;;  %v2502_v6 = vpop.f32.mrb[33].mxu1  ;;  %2540 = vmatprep.subr.bf16.mxu0 %v2721_v1 }
 0x3fb   : > { %v1621_v8 = vpop.f32.mrb[34].mxu1 }
 0x3fc   : > { %v2503_v9 = vpop.f32.mrb[35].mxu1  ;;  %2525 = vmatmul.mubr.msk.bf16.vlgmr.msra.gmra.mrb[40].mxu1 %vm1298_vm2, %v1717_v5  ;;  %v2293_v5 = vld [vmem:[%s3251_s15] ss:$0 sm:$0xff] }
 0x3fd   : > { %v1664_v10 = vpop.f32.mrb[36].mxu0  ;;  %2535 = vmatpush3.bf16.msra.mxu1 %v1866_v7  ;;  %2536 = vmatprep.mubr.msk.bf16.mxu1 %vm2722_vm0, %v2721_v1 }
 0x3fe   : > { %v1718_v11 = vpack.c.bf16 %v1664_v10, %v1664_v10  ;;  %v2508_v12 = vpop.f32.mrb[37].mxu0  ;;  %2548 = vmatprep.subr.bf16.mxu1 %v2721_v1 }
 0x3ff   : > { %v1667_v13 = vpop.f32.mrb[38].mxu0 }
 0x400   : > { %v2509_v14 = vpop.f32.mrb[39].mxu0  ;;  %2531 = vmatmul.mubr.msk.bf16.vlgmr.msra.gmra.mrb[44].mxu0 %vm1298_vm2, %v1718_v11 }
 0x401   : > { %v1710_v15 = vpop.f32.mrb[36].mxu1  ;;  %2544 = vmatprep.mubr.msk.bf16.mxu0 %vm2722_vm0, %v2721_v1  ;;  %2541 = vmatpush3.bf16.msra.mxu0 %v2633_v20 }
 0x402   : > { %v1719_v16 = vpack.c.bf16 %v1710_v15, %v1710_v15  ;;  %v2514_v17 = vpop.f32.mrb[37].mxu1  ;;  %2542 = vmatprep.subr.bf16.mxu0 %v2721_v1 }
 0x403   : > { %v1713_v18 = vpop.f32.mrb[38].mxu1 }
 0x404   : > { %v2515_v19 = vpop.f32.mrb[39].mxu1  ;;  %2537 = vmatmul.mubr.msk.bf16.vlgmr.msra.gmra.mrb[44].mxu1 %vm1298_vm2, %v1719_v16 }
 0x405   : > { %2556 = vmatprep.mubr.msk.bf16.mxu1 %vm2722_vm0, %v2721_v1  ;;  %2543 = vmatpush3.bf16.msra.mxu0 %v2634_v21 }
 0x406   : > { %2560 = vmatprep.subr.bf16.mxu0 %v2721_v1  ;;  %2549 = vmatpush3.bf16.msra.mxu1 %v2635_v22 }
 0x407   : > { %2550 = vmatprep.subr.bf16.mxu1 %v2721_v1 }
 0x40a   : > { %2551 = vmatpush3.bf16.msra.mxu1 %v2636_v23 }
 0x40b   : > { %2552 = vmatprep.subr.bf16.mxu1 %v2721_v1 }
 0x40e   : > { %2553 = vmatpush3.bf16.msra.mxu1 %v2637_v50 }
 0x40f   : > { %2554 = vmatprep.subr.bf16.mxu1 %v2721_v1 }
 0x412   : > { %2555 = vmatpush3.bf16.msra.mxu1 %v2638_v51 }
 0x4cb   : > { %v1764_v24 = vpop.f32.mrb[40].mxu0 }
 0x4cc   : > { %v2520_v25 = vpop.f32.mrb[41].mxu0  ;;  %v1908_v29 = vsel %vm578_vm1, %v1764_v24, 0.0 }
 0x4cd   : > { %v1767_v26 = vpop.f32.mrb[42].mxu0 }
 0x4ce   : > { %v2521_v27 = vpop.f32.mrb[43].mxu0 }
 0x4cf   : > { %v1810_v28 = vpop.f32.mrb[40].mxu1 }
 0x4d0   : > { %v1909_v30 = vsel %vm578_vm1, %v1810_v28, 0.0  ;;  %v2526_v31 = vpop.f32.mrb[41].mxu1 }
 0x4d1   : > { %v1910_v32 = vadd.f32 %v1909_v30, %v1908_v29  ;;  %v1813_v33 = vpop.f32.mrb[42].mxu1 }
 0x4d2   : > { %v2527_v34 = vpop.f32.mrb[43].mxu1 }
 0x4d3   : > { %v1856_v35 = vpop.f32.mrb[44].mxu0 }
 0x4d4   : > { %v1911_v36 = vsel %vm578_vm1, %v1856_v35, 0.0  ;;  %v2532_v37 = vpop.f32.mrb[45].mxu0 }
 0x4d5   : > { %v1912_v38 = vadd.f32 %v1911_v36, %v1910_v32  ;;  %v1859_v39 = vpop.f32.mrb[46].mxu0 }
 0x4d6   : > { %v2533_v40 = vpop.f32.mrb[47].mxu0 }
 0x4d7   : > { %v1902_v41 = vpop.f32.mrb[44].mxu1 }
 0x4d8   : > { %v1913_v42 = vsel %vm578_vm1, %v1902_v41, 0.0  ;;  %v2538_v44 = vpop.f32.mrb[45].mxu1 }
 0x4d9   : > { %v1914_v45 = vadd.f32 %v1913_v42, %v1912_v38  ;;  %v1905_v48 = vpop.f32.mrb[46].mxu1 }
 0x4da   : > { %v2539_v46 = vpop.f32.mrb[47].mxu1 }
 0x4db   : > { %v1922_v49 = vadd.f32 %v2282_v43, %v1914_v45 }
 0x4dd   : > { %v1923_v47 = vpack.c.bf16 %v1922_v49, %v1922_v49 }
 0x4df   : > { %2545 = vmatmul.mubr.msk.bf16.vlgmr.msra.gmra.mrb[48].mxu0 %vm578_vm1, %v1923_v47 }
 0x4e0   : > { %2564 = vmatprep.mubr.msk.bf16.mxu0 %vm2722_vm0, %v2721_v1  ;;  %2561 = vmatpush3.bf16.msra.mxu0 %v2639_v52 }
 0x4e1   : > { %2562 = vmatprep.subr.bf16.mxu0 %v2721_v1  ;;  %v2287_v1 = vld [vmem:[%s3249_s13] ss:$0 sm:$0xff] }
 0x4e4   : > { %2563 = vmatpush3.bf16.msra.mxu0 %v2640_v61 }
 0x5b2   : > { %v1984_v54 = vpop.f32.mrb[48].mxu0 }
 0x5b3   : > { %v1985_v55 = vadd.f32 %v2283_v53, %v1984_v54  ;;  %v2546_v56 = vpop.f32.mrb[49].mxu0 }
 0x5b4   : > { %v1987_v57 = vpop.f32.mrb[50].mxu0 }
 0x5b5   : > { %v1990_v58 = vmax.f32 %v1985_v55, 0.0  ;;  %v2547_v59 = vpop.f32.mrb[51].mxu0 }
 0x5b7   : > { %v1991_v60 = vpack.c.bf16 %v1990_v58, %v1990_v58 }
 0x5b9   : > { %2557 = vmatmul.mubr.msk.bf16.vlgmr.msra.gmra.mrb[48].mxu1 %vm2031_vm4, %v1991_v60 }
 0x68c   : > { %v2069_v62 = vpop.f32.mrb[48].mxu1 }
 0x68d   : > { %v2070_v63 = vadd.f32 %v2287_v1, %v2069_v62  ;;  %v2558_v0 = vpop.f32.mrb[49].mxu1 }
 0x68e   : > { %v2072_v2 = vpop.f32.mrb[50].mxu1 }
 0x68f   : > { %v2075_v3 = vpack.c.bf16 %v2070_v63, %v2070_v63  ;;  %v2559_v4 = vpop.f32.mrb[51].mxu1 }
 0x691   : > { %2565 = vmatmul.mubr.msk.bf16.vlgmr.msra.gmra.mrb[52].mxu0 %vm578_vm1, %v2075_v3 }
 0x764   : > { %v2136_v6 = vpop.f32.mrb[52].mxu0 }
 0x765   : > { %v2137_v7 = vadd.f32 %v2293_v5, %v2136_v6  ;;  %v2566_v8 = vpop.f32.mrb[53].mxu0 }
 0x766   : > { %v2139_v9 = vpop.f32.mrb[54].mxu0 }
 0x767   : > { %2142 = vst [vmem:[%s512_s29] sm:$0xff] %v2137_v7  ;;  %v2567_v10 = vpop.f32.mrb[55].mxu0 }
 0x768   : > { %2670 = shalt.err (!%p2667_p3)
}
 0x769   : > { %s2671_s30 = scalar_lea.hbm %s3194_s23, 128  ;;  %s2675_s19 = scalar_lea.hbm %s3252_s16, 256 }
 0x76a   : > { %p2672_p4 = scmp.ne.s32.totalorder %s3194_s23, %s2671_s30  ;;  %p2676_p9 = scmp.lt.u32.totalorder %s3194_s23, %s3252_s16 }
 0x76b   : > { %p2677_p10 = scmp.lt.u32.totalorder %s2675_s19, %s2671_s30  ;;  %p2679_p12 = scmp.lt.u32.totalorder %s2671_s30, %s3194_s23 }
 0x76c   : > { %p2673_p7 = pnand %p2672_p4, %p2847_p5 }
 0x76d   : > { %p2678_p11 = por %p2677_p10, %p2676_p9 }
 0x76e   : > { %p2674_p8 = pneg %p2673_p7 }
 0x76f   : > { %p2680_p13 = por %p2679_p12, %p2678_p11 }
 0x771   : > { %p2681_p0 = pnand %p2680_p13, %p2674_p8 }
 0x773   : > { %2684 = shalt.err (!%p2681_p0)
}
 0x774   : > { %2568 = dma.vmem_to_hbm [thread:$0]  (%p2847_p5), %s3196_s18, 128, %s3194_s23, %s2144_s27  }
 0x775 PF: > { %s3267_s25 = sld [smem:[#allocation5_spill]]  ;;  %p2574_p1 = scmp.ge.s32.totalorder %s2719_s24, 2 }
 0x777   : > { %p2571_p2 = pnand %p2574_p1, %p2851_p6 }
 0x77b   : > { %s2169_s26 = sand.u32 1, %s3267_s25  }
 0x77c   : > { %s2170_s28 = scalar_lea.sflag [#allocation3], %s2169_s26 }
 0x77d   : > { %2702 = dma.done.wait (!%p2571_p2), %s2170_s28, 128  }
 0x77e   : > { %2704 = vsyncadd (!%p2571_p2), %s2170_s28, 4294967168  ;;  %s3269_s24 = sld [smem:[#allocation7_spill]]  ;;  %s3270_s30 = sld [smem:[#allocation6_spill]] }
 0x77f   : > { %s3271_s23 = sld [smem:[#allocation8_spill]]  ;;  %s3272_s21 = smov %s2711_s22 }
 0x784   : > { %p26_p3 = scmp.ge.s32.totalorder %s3269_s24, 4   ;;  %s3273_s22 = smov %s3270_s30 }
 0x786   :  { %28 = sbr.rel (!%p26_p3) target bundleno = 5 (0x5), region = 119 }
 0x78d   :  { %2175 = vsyncpa [#allocation3], 1 }
 0x78e   :  { %2177 = vsyncpa [#allocation3 + $0x1], 1 }

</bundles_post_ra>
